<compile_context>
chip_gen: v7x
topology: tpu7x:2x2x1
jax: 0.10.0
libtpu: 0.0.40
codegen_flags: <defaults>
</compile_context>

<pallas_src>
import functools

import jax
import jax.numpy as jnp
from jax.experimental import pallas as pl
from jax.experimental.pallas import tpu as pltpu


_LANE = 128     # last-dim padding target (vreg lane width)
_SUBLANE = 8    # batch padding target (vreg sublane width)


def _round_up(n, m):
    return (n + m - 1) // m * m


def _mlp_kernel(x_ref, w1_ref, b1_ref, w2_ref, b2_ref, o_ref):
    # linear1 + ReLU: MXU matmul with f32 accumulation; bias/ReLU on VPU in f32.
    h = jnp.dot(x_ref[...], w1_ref[...], preferred_element_type=jnp.float32)
    h = jnp.maximum(h + b1_ref[...], 0.0)            # (TB, H) + (1, H)
    # linear2 + sigmoid: cast activations to the weight dtype for the MXU
    # (no-op in the f32 path), accumulate in f32; sigmoid goes to the EUP.
    z = jnp.dot(h.astype(w2_ref.dtype), w2_ref[...],
                preferred_element_type=jnp.float32)
    o_ref[...] = jax.nn.sigmoid(z + b2_ref[...]).astype(o_ref.dtype)


def _pick_batch_tile(batch, d_in_p, h_p, d_out_p,
                     act_budget_bytes=20 * 1024 * 1024):
    """Largest batch tile (multiple of 8, capped at 512) whose double-buffered
    x/out tiles plus the hidden intermediate fit a conservative VMEM budget
    (sized for v7x's 64 MiB VMEM; v5e/v6e have more headroom)."""
    tb = min(_round_up(batch, _SUBLANE), 512)
    while tb > _SUBLANE:
        act_bytes = 4 * tb * (2 * d_in_p + 2 * d_out_p + h_p)
        if act_bytes <= act_budget_bytes:
            break
        tb = max(_SUBLANE, _round_up(tb // 2, _SUBLANE))
    return tb


def mlp_multilabel_forward(x, w1, b1, w2, b2, *, compute_dtype=jnp.float32):
    """Fused forward: sigmoid(relu(x @ w1 + b1) @ w2 + b2).

    x  : (B, D_in)   float32
    w1 : (D_in, H)      b1 : (H,)        (weights pre-transposed vs. torch Linear)
    w2 : (H, D_out)     b2 : (D_out,)
    compute_dtype: dtype fed to the MXU (f32, or bf16 on v6e/v7x for ~2x
                   matmul throughput and half the weight DMA; f32 accumulation
                   and f32 bias/ReLU/sigmoid are kept either way).
    """
    B, D_in = x.shape
    H = w1.shape[1]
    D_out = w2.shape[1]

    # --- host-side padding to hardware-friendly shapes -----------------------
    d_in_p = _round_up(D_in, _LANE)
    h_p = _round_up(H, _LANE)
    d_out_p = _round_up(D_out, _LANE)

    tb = _pick_batch_tile(B, d_in_p, h_p, d_out_p)
    b_pad = _round_up(B, tb)
    grid = (b_pad // tb,)

    x_p = jnp.zeros((b_pad, d_in_p), compute_dtype).at[:B, :D_in].set(
        x.astype(compute_dtype))
    w1_p = jnp.zeros((d_in_p, h_p), compute_dtype).at[:D_in, :H].set(
        w1.astype(compute_dtype))
    w2_p = jnp.zeros((h_p, d_out_p), compute_dtype).at[:H, :D_out].set(
        w2.astype(compute_dtype))
    # Biases stay f32 (added to the f32 accumulator) and are kept 2-D so they
    # broadcast over the batch (sublane) axis inside the kernel.
    b1_p = jnp.zeros((1, h_p), jnp.float32).at[0, :H].set(b1.astype(jnp.float32))
    b2_p = jnp.zeros((1, d_out_p), jnp.float32).at[0, :D_out].set(
        b2.astype(jnp.float32))

    # --- VMEM budget: resident weights + double-buffered x/out tiles ---------
    wbytes = jnp.dtype(compute_dtype).itemsize
    est = (4 * tb * (2 * d_in_p + 2 * d_out_p + h_p)
           + wbytes * (d_in_p * h_p + h_p * d_out_p)
           + 4 * (h_p + d_out_p))
    vmem_limit = int(min(48 * 1024 * 1024, max(32 * 1024 * 1024, 2 * est)))

    out_padded = pl.pallas_call(
        _mlp_kernel,
        out_shape=jax.ShapeDtypeStruct((b_pad, d_out_p), jnp.float32),
        grid=grid,
        in_specs=[
            pl.BlockSpec((tb, d_in_p), lambda i: (i, 0)),     # x: batch-tiled
            pl.BlockSpec((d_in_p, h_p), lambda i: (0, 0)),    # W1: VMEM-resident
            pl.BlockSpec((1, h_p), lambda i: (0, 0)),         # b1: VMEM-resident
            pl.BlockSpec((h_p, d_out_p), lambda i: (0, 0)),   # W2: VMEM-resident
            pl.BlockSpec((1, d_out_p), lambda i: (0, 0)),     # b2: VMEM-resident
        ],
        out_specs=pl.BlockSpec((tb, d_out_p), lambda i: (i, 0)),
        compiler_params=pltpu.CompilerParams(
            dimension_semantics=("parallel",),   # batch tiles are independent
            vmem_limit_bytes=vmem_limit,
        ),
    )(x_p, w1_p, b1_p, w2_p, b2_p)

    # Slice away batch padding and lane padding (padded output cols = 0.5).
    return out_padded[:B, :D_out]


def init_params(key, input_dim, output_dim):
    """torch.nn.Linear-style init (uniform +/- 1/sqrt(fan_in)); weights stored
    pre-transposed as (in_features, out_features), biases 1-D."""
    hidden_dim = (input_dim + output_dim) // 2
    k1, k2, k3, k4 = jax.random.split(key, 4)
    bound1 = 1.0 / float(input_dim) ** 0.5
    bound2 = 1.0 / float(hidden_dim) ** 0.5
    w1 = jax.random.uniform(k1, (input_dim, hidden_dim), jnp.float32, -bound1, bound1)
    b1 = jax.random.uniform(k2, (hidden_dim,), jnp.float32, -bound1, bound1)
    w2 = jax.random.uniform(k3, (hidden_dim, output_dim), jnp.float32, -bound2, bound2)
    b2 = jax.random.uniform(k4, (output_dim,), jnp.float32, -bound2, bound2)
    return w1, b1, w2, b2


if __name__ == "__main__":
    key = jax.random.PRNGKey(0)
    B, input_dim, output_dim = 8, 32, 16   # hidden_dim = (32 + 16) // 2 = 24

    kx, kp = jax.random.split(key)
    x = jax.random.normal(kx, (B, input_dim), jnp.float32)
    w1, b1, w2, b2 = init_params(kp, input_dim, output_dim)

    fwd = jax.jit(functools.partial(mlp_multilabel_forward,
                                    compute_dtype=jnp.float32))
    out = fwd(x, w1, b1, w2, b2)
    jax.block_until_ready(out)

    # Pure-JAX reference check.
    ref = jax.nn.sigmoid(jnp.maximum(x @ w1 + b1, 0.0) @ w2 + b2)
    assert out.shape == (B, output_dim), out.shape
    assert jnp.allclose(out, ref, atol=1e-5, rtol=1e-5)

    print("KERNEL_OK")
</pallas_src>

<mosaic_0001>
module attributes {stable_mosaic.version = 11 : i64} {
  func.func @_mlp_kernel(%arg0: i32, %arg1: memref<8x128xf32, #tpu.memory_space<vmem>>, %arg2: memref<128x128xf32, #tpu.memory_space<vmem>>, %arg3: memref<1x128xf32, #tpu.memory_space<vmem>>, %arg4: memref<128x128xf32, #tpu.memory_space<vmem>>, %arg5: memref<1x128xf32, #tpu.memory_space<vmem>>, %arg6: memref<8x128xf32, #tpu.memory_space<vmem>>) attributes {dimension_semantics = [#tpu.dimension_semantics<parallel>], iteration_bounds = array<i64: 1>, scalar_prefetch = 0 : i64, scratch_operands = 0 : i64, tpu.core_type = #tpu.core_type<tc>, window_params = [{transform_indices = @transform_0, window_bounds = array<i64: 8, 128>}, {pipeline_mode = #tpu.pipeline_mode<synchronous>, transform_indices = @transform_1, window_bounds = array<i64: 128, 128>}, {pipeline_mode = #tpu.pipeline_mode<synchronous>, transform_indices = @transform_2, window_bounds = array<i64: 1, 128>}, {pipeline_mode = #tpu.pipeline_mode<synchronous>, transform_indices = @transform_3, window_bounds = array<i64: 128, 128>}, {pipeline_mode = #tpu.pipeline_mode<synchronous>, transform_indices = @transform_4, window_bounds = array<i64: 1, 128>}, {transform_indices = @transform_5, window_bounds = array<i64: 8, 128>}]} {
    %c0 = arith.constant 0 : index
    %c0_0 = arith.constant 0 : index
    %0 = vector.load %arg1[%c0, %c0_0] : memref<8x128xf32, #tpu.memory_space<vmem>>, vector<8x128xf32>
    %c0_1 = arith.constant 0 : index
    %c0_2 = arith.constant 0 : index
    %1 = vector.load %arg2[%c0_1, %c0_2] : memref<128x128xf32, #tpu.memory_space<vmem>>, vector<128x128xf32>
    %cst = arith.constant dense<0.000000e+00> : vector<8x128xf32>
    %2 = tpu.matmul %0, %1, %cst {dimension_numbers = #tpu.dot_dimension_numbers<[1], [0], [0], [1], [0, 0, 1, 1], [], []>} : vector<8x128xf32>, vector<128x128xf32>, vector<8x128xf32> -> vector<8x128xf32>
    %c0_3 = arith.constant 0 : index
    %c0_4 = arith.constant 0 : index
    %3 = vector.load %arg3[%c0_3, %c0_4] : memref<1x128xf32, #tpu.memory_space<vmem>>, vector<1x128xf32>
    %4 = vector.broadcast %3 : vector<1x128xf32> to vector<8x128xf32>
    %5 = arith.addf %2, %4 : vector<8x128xf32>
    %cst_5 = arith.constant 0.000000e+00 : f32
    %6 = vector.broadcast %cst_5 : f32 to vector<8x128xf32>
    %7 = arith.maximumf %5, %6 : vector<8x128xf32>
    %c0_6 = arith.constant 0 : index
    %c0_7 = arith.constant 0 : index
    %8 = vector.load %arg4[%c0_6, %c0_7] : memref<128x128xf32, #tpu.memory_space<vmem>>, vector<128x128xf32>
    %cst_8 = arith.constant dense<0.000000e+00> : vector<8x128xf32>
    %9 = tpu.matmul %7, %8, %cst_8 {dimension_numbers = #tpu.dot_dimension_numbers<[1], [0], [0], [1], [0, 0, 1, 1], [], []>} : vector<8x128xf32>, vector<128x128xf32>, vector<8x128xf32> -> vector<8x128xf32>
    %c0_9 = arith.constant 0 : index
    %c0_10 = arith.constant 0 : index
    %10 = vector.load %arg5[%c0_9, %c0_10] : memref<1x128xf32, #tpu.memory_space<vmem>>, vector<1x128xf32>
    %11 = vector.broadcast %10 : vector<1x128xf32> to vector<8x128xf32>
    %12 = arith.addf %9, %11 : vector<8x128xf32>
    %13 = arith.negf %12 : vector<8x128xf32>
    %14 = math.exp %13 : vector<8x128xf32>
    %cst_11 = arith.constant 1.000000e+00 : f32
    %15 = vector.broadcast %cst_11 : f32 to vector<8x128xf32>
    %16 = arith.addf %15, %14 : vector<8x128xf32>
    %17 = arith.divf %15, %16 : vector<8x128xf32>
    %c0_12 = arith.constant 0 : index
    %c0_13 = arith.constant 0 : index
    %18 = vector.load %arg6[%c0_12, %c0_13] : memref<8x128xf32, #tpu.memory_space<vmem>>, vector<8x128xf32>
    tpu.vector_store %arg6[%c0_12, %c0_13], %17 {strides = array<i32>} : memref<8x128xf32, #tpu.memory_space<vmem>>, vector<8x128xf32>,
    return
  }
  func.func @transform_0(%arg0: i32) -> (i32, i32) {
    %c0_i32 = arith.constant 0 : i32
    %c0_i32_0 = arith.constant 0 : i32
    return %arg0, %c0_i32 : i32, i32
  }
  func.func @transform_1(%arg0: i32) -> (i32, i32) {
    %c0_i32 = arith.constant 0 : i32
    %c0_i32_0 = arith.constant 0 : i32
    %c0_i32_1 = arith.constant 0 : i32
    return %c0_i32, %c0_i32_0 : i32, i32
  }
  func.func @transform_2(%arg0: i32) -> (i32, i32) {
    %c0_i32 = arith.constant 0 : i32
    %c0_i32_0 = arith.constant 0 : i32
    %c0_i32_1 = arith.constant 0 : i32
    return %c0_i32, %c0_i32_0 : i32, i32
  }
  func.func @transform_3(%arg0: i32) -> (i32, i32) {
    %c0_i32 = arith.constant 0 : i32
    %c0_i32_0 = arith.constant 0 : i32
    %c0_i32_1 = arith.constant 0 : i32
    return %c0_i32, %c0_i32_0 : i32, i32
  }
  func.func @transform_4(%arg0: i32) -> (i32, i32) {
    %c0_i32 = arith.constant 0 : i32
    %c0_i32_0 = arith.constant 0 : i32
    %c0_i32_1 = arith.constant 0 : i32
    return %c0_i32, %c0_i32_0 : i32, i32
  }
  func.func @transform_5(%arg0: i32) -> (i32, i32) {
    %c0_i32 = arith.constant 0 : i32
    %c0_i32_0 = arith.constant 0 : i32
    return %arg0, %c0_i32 : i32, i32
  }
}

</mosaic_0001>

<bundles_post_ra>
// kernel: mlp_multilabel_forward.1
= control target key start
LH: loop header
LB: loop body
LE: loop exit
PB: predicated region body
PF: predicated region fallthrough
CT: control target
= control target key end

     0   :  { %v417_v3 = vmov 0.0|0.0   ;;  %vm418_vm0 = vmmov 0   ;;  %v419_v6 = vmov 0.0   ;;  %s584_s0 = inlined_call_operand.vmem [shape: f32[8,128], index: 0, kind: input, shape index: {}]   ;;  %s585_s1 = inlined_call_operand.vmem [shape: f32[128,128], index: 1, kind: input, shape index: {}]   ;;  %s586_s2 = inlined_call_operand.vmem [shape: f32[1,128], index: 2, kind: input, shape index: {}]   ;;  %s587_s3 = inlined_call_operand.vmem [shape: f32[128,128], index: 3, kind: input, shape index: {}]   ;;  %s588_s4 = inlined_call_operand.vmem [shape: f32[1,128], index: 4, kind: input, shape index: {}]   ;;  %s589_s5 = inlined_call_operand.hbm [shape: f32[8,128], index: 5, kind: output, shape index: {}]  }
   0x1   :  { %v22_v0 = vld [vmem:[%s585_s1] sm:$0xff]  ;;  %v23_v1 = vld [vmem:[%s585_s1 + $0x8] sm:$0xff]  ;;  %v24_v2 = vld [vmem:[%s585_s1 + $0x10] sm:$0xff]  ;;  %337 = vmatprep.subr.bf16.mxu0 %v417_v3  ;;  %299 = vmatprep.mubr.msk.f32.mxu0 %vm418_vm0, %v419_v6 }
   0x2   :  { %v338_v4 = vpack.c.bf16 %v23_v1, %v22_v0  ;;  %v25_v5 = vld [vmem:[%s585_s1 + $0x18] sm:$0xff]  ;;  %361 = vmatprep.subr.bf16.mxu1 %v417_v3  ;;  %334 = vmatprep.mubr.msk.f32.mxu1 %vm418_vm0, %v419_v6  ;;  %v26_v8 = vld [vmem:[%s585_s1 + $0x20] sm:$0xff]  ;;  %v27_v9 = vld [vmem:[%s585_s1 + $0x28] sm:$0xff] }
   0x3   :  { %v341_v7 = vpack.c.bf16 %v25_v5, %v24_v2  ;;  %v116_v10 = vld [vmem:[%s587_s3] sm:$0xff]  ;;  %v117_v11 = vld [vmem:[%s587_s3 + $0x8] sm:$0xff]  ;;  %v118_v12 = vld [vmem:[%s587_s3 + $0x10] sm:$0xff]  ;;  %v344_v14 = vpack.c.bf16 %v27_v9, %v26_v8 }
   0x4   :  { %339 = vmatpush3.bf16.msra.mxu0 %v338_v4  ;;  %v119_v13 = vld [vmem:[%s587_s3 + $0x18] sm:$0xff]  ;;  %v362_v15 = vpack.c.bf16 %v117_v11, %v116_v10  ;;  %v28_v16 = vld [vmem:[%s585_s1 + $0x30] sm:$0xff]  ;;  %v120_v19 = vld [vmem:[%s587_s3 + $0x20] sm:$0xff] }
   0x5   :  { %340 = vmatprep.subr.bf16.mxu0 %v417_v3  ;;  %v29_v17 = vld [vmem:[%s585_s1 + $0x38] sm:$0xff]  ;;  %v365_v18 = vpack.c.bf16 %v119_v13, %v118_v12  ;;  %v121_v20 = vld [vmem:[%s587_s3 + $0x28] sm:$0xff] }
   0x6   :  { %363 = vmatpush3.bf16.msra.mxu1 %v362_v15 }
   0x7   :  { %364 = vmatprep.subr.bf16.mxu1 %v417_v3 }
   0x8   :  { %342 = vmatpush3.bf16.msra.mxu0 %v341_v7 }
   0x9   :  { %343 = vmatprep.subr.bf16.mxu0 %v417_v3 }
   0xa   :  { %10 = vsyncpa [#allocation3], 0  ;;  %v347_v21 = vpack.c.bf16 %v29_v17, %v28_v16  ;;  %v30_v22 = vld [vmem:[%s585_s1 + $0x40] sm:$0xff]  ;;  %v31_v23 = vld [vmem:[%s585_s1 + $0x48] sm:$0xff]  ;;  %366 = vmatpush3.bf16.msra.mxu1 %v365_v18  ;;  %v368_v24 = vpack.c.bf16 %v121_v20, %v120_v19 }
   0xb   :  { %367 = vmatprep.subr.bf16.mxu1 %v417_v3  ;;  %v122_v25 = vld [vmem:[%s587_s3 + $0x30] sm:$0xff]  ;;  %v123_v26 = vld [vmem:[%s587_s3 + $0x38] sm:$0xff]  ;;  %v350_v27 = vpack.c.bf16 %v31_v23, %v30_v22  ;;  %v124_v31 = vld [vmem:[%s587_s3 + $0x40] sm:$0xff] }
   0xc   :  { %345 = vmatpush3.bf16.msra.mxu0 %v344_v14  ;;  %v32_v28 = vld [vmem:[%s585_s1 + $0x50] sm:$0xff]  ;;  %v33_v29 = vld [vmem:[%s585_s1 + $0x58] sm:$0xff]  ;;  %v371_v30 = vpack.c.bf16 %v123_v26, %v122_v25  ;;  %v125_v32 = vld [vmem:[%s587_s3 + $0x48] sm:$0xff] }
   0xd   :  { %346 = vmatprep.subr.bf16.mxu0 %v417_v3  ;;  %v353_v33 = vpack.c.bf16 %v33_v29, %v32_v28  ;;  %v34_v34 = vld [vmem:[%s585_s1 + $0x60] sm:$0xff]  ;;  %v35_v35 = vld [vmem:[%s585_s1 + $0x68] sm:$0xff]  ;;  %v374_v36 = vpack.c.bf16 %v125_v32, %v124_v31  ;;  %v126_v37 = vld [vmem:[%s587_s3 + $0x50] sm:$0xff] }
   0xe   :  { %369 = vmatpush3.bf16.msra.mxu1 %v368_v24  ;;  %v127_v38 = vld [vmem:[%s587_s3 + $0x58] sm:$0xff]  ;;  %v356_v39 = vpack.c.bf16 %v35_v35, %v34_v34  ;;  %v36_v40 = vld [vmem:[%s585_s1 + $0x70] sm:$0xff]  ;;  %v128_v43 = vld [vmem:[%s587_s3 + $0x60] sm:$0xff] }
   0xf   :  { %370 = vmatprep.subr.bf16.mxu1 %v417_v3  ;;  %v37_v41 = vld [vmem:[%s585_s1 + $0x78] sm:$0xff]  ;;  %v377_v42 = vpack.c.bf16 %v127_v38, %v126_v37  ;;  %v129_v44 = vld [vmem:[%s587_s3 + $0x68] sm:$0xff]  ;;  %v21_v47 = vld [vmem:[%s584_s0] sm:$0xff] }
  0x10   :  { %348 = vmatpush3.bf16.msra.mxu0 %v347_v21  ;;  %v359_v45 = vpack.c.bf16 %v37_v41, %v36_v40  ;;  %v380_v46 = vpack.c.bf16 %v129_v44, %v128_v43  ;;  %v130_v48 = vld [vmem:[%s587_s3 + $0x70] sm:$0xff]  ;;  %v131_v49 = vld [vmem:[%s587_s3 + $0x78] sm:$0xff]  ;;  %v230_v51 = vld [vmem:[%s586_s2] ss:$0 sm:$0xff]  ;;  %s420_s3 = smov [#allocation2]  }
  0x11   :  { %349 = vmatprep.subr.bf16.mxu0 %v417_v3  ;;  %v383_v50 = vpack.c.bf16 %v131_v49, %v130_v48  ;;  %v231_v56 = vld [vmem:[%s588_s4] ss:$0 sm:$0xff]  ;;  %s222_s11 = sshll.u32 %s420_s3, 4  ;;  %s223_s11 = int_to_ptr.vmem [resolvable:$true] %s222_s11 }
  0x12   :  { %372 = vmatpush3.bf16.msra.mxu1 %v371_v30  ;;  %s393_s2 = scalar_lea.vmem %s223_s11, 128  ;;  %p398_p1 = scmp.lt.s32.totalorder %s223_s11, %s223_s11 }
  0x13   :  { %373 = vmatprep.subr.bf16.mxu1 %v417_v3  ;;  %p394_p0 = scmp.ne.s32.totalorder %s223_s11, %s393_s2  ;;  %p399_p2 = scmp.lt.s32.totalorder %s393_s2, %s393_s2 }
  0x14   :  { %351 = vmatpush3.bf16.msra.mxu0 %v350_v27 }
  0x15   :  { %352 = vmatprep.subr.bf16.mxu0 %v417_v3  ;;  %p400_p3 = por %p399_p2, %p398_p1 }
  0x16   :  { %375 = vmatpush3.bf16.msra.mxu1 %v374_v36 }
  0x17   :  { %376 = vmatprep.subr.bf16.mxu1 %v417_v3  ;;  %p401_p4 = pnand %p400_p3, %p394_p0 }
  0x18   :  { %354 = vmatpush3.bf16.msra.mxu0 %v353_v33 }
  0x19   :  { %355 = vmatprep.subr.bf16.mxu0 %v417_v3 }
  0x1a   :  { %378 = vmatpush3.bf16.msra.mxu1 %v377_v42 }
  0x1b   :  { %379 = vmatprep.subr.bf16.mxu1 %v417_v3 }
  0x1c   :  { %357 = vmatpush3.bf16.msra.mxu0 %v356_v39 }
  0x1d   :  { %358 = vmatprep.subr.bf16.mxu0 %v417_v3 }
  0x1e   :  { %381 = vmatpush3.bf16.msra.mxu1 %v380_v46 }
  0x1f   :  { %382 = vmatprep.subr.bf16.mxu1 %v417_v3 }
  0x20   :  { %360 = vmatpush3.bf16.msra.mxu0 %v359_v45 }
  0x22   :  { %384 = vmatpush3.bf16.msra.mxu1 %v383_v50 }
  0x23   :  { %300 = vmatmul.mubr.f32.vlgmr.msra.gmra.mrb[0].mxu0 %v21_v47 }
  0xf6   :  { %v111_v52 = vpop.f32.mrb[0].mxu0 }
  0xf7   :  { %v112_v53 = vadd.f32 %v230_v51, %v111_v52  ;;  %v301_v54 = vpop.f32.mrb[1].mxu0 }
  0xf9   :  { %v115_v55 = vmax.f32 %v112_v53, 0.0 }
  0xfb   :  { %335 = vmatmul.mubr.f32.vlgmr.msra.gmra.mrb[0].mxu1 %v115_v55 }
 0x1ce   :  { %v205_v57 = vpop.f32.mrb[0].mxu1 }
 0x1cf   :  { %v206_v58 = vadd.f32 %v231_v56, %v205_v57  ;;  %v336_v59 = vpop.f32.mrb[1].mxu1 }
 0x1d1   :  { %v232_v60 = vmul.f32 -1.442695, %v206_v58 }
 0x1d3   :  { %389 = vpow2.f32 %v232_v60 }
 0x1dd   :  { %v390_v61 = vpop.eup %389 }
 0x1de   :  { %v212_v62 = vadd.f32 1.0, %v390_v61 }
 0x1e0   :  { %391 = vrcp.f32 %v212_v62 }
 0x1ea   :  { %v392_v63 = vpop.eup %391 }
 0x1eb   :  { %215 = vst [vmem:[#allocation2] sm:$0xff] %v392_v63 }
 0x1ec   :  { %404 = shalt.err (!%p401_p4)
}
 0x1ed   :  { %s405_s13 = scalar_lea.hbm %s589_s5, 128 }
 0x1ee   :  { %p406_p5 = scmp.ne.s32.totalorder %s589_s5, %s405_s13  ;;  %p409_p6 = scmp.lt.u32.totalorder %s405_s13, %s589_s5 }
 0x1f0   :  { %p411_p7 = pnand %p409_p6, %p406_p5 }
 0x1f2   :  { %414 = shalt.err (!%p411_p7)
}
 0x1f3   :  { %225 = dma.vmem_to_hbm [thread:$0]  %s223_s11, 128, %s589_s5, [#allocation3]  }
 0x1f4   :  { %415 = dma.done.wait [#allocation3], 128  }
 0x1f5   :  { %416 = vsyncadd [#allocation3], 4294967168 }
 0x1f6   :  { %229 = vsyncpa [#allocation3], 1 }

</bundles_post_ra>
